<compile_context>
chip_gen: v5e
topology: v5e:2x2
jax: 0.10.0
libtpu: 0.0.40
codegen_flags: <defaults>
</compile_context>

<pallas_src>
import math

import jax
import jax.numpy as jnp
from jax import lax
from jax.experimental import pallas as pl
from jax.experimental.pallas import tpu as pltpu


def _make_kernel(temperature: float, dim_t: int, h_size: int, pe_dtype, out_dtype):
    log_temp = math.log(temperature)
    inv_h = 1.0 / float(h_size)

    def kernel(x_ref, o_ref):
        # x_ref / o_ref block shape: (tR, W, C); rows are flattened (n, h).
        tr, w, c = x_ref.shape

        # --- per-channel tables: (1, C).  No vector integer //, % ----------
        c_i = lax.broadcasted_iota(jnp.int32, (1, c), 1)
        q1 = (c_i >= dim_t).astype(jnp.int32)
        q2 = (c_i >= 2 * dim_t).astype(jnp.int32)
        q3 = (c_i >= 3 * dim_t).astype(jnp.int32)
        grp = q1 + q2 + q3                                   # channel quarter 0..3
        d = (c_i - grp * dim_t).astype(jnp.float32)          # c % dim_t
        # omega[c] = 1 / T ** (d / dim_t) = exp(-ln(T) * d / dim_t)
        omega = jnp.exp(d * (-log_temp / dim_t))             # (1, C)
        use_sin = (grp == 0) | (grp == 2)                    # quarters 0, 2 -> sin
        is_x_chan = grp < 2                                  # quarters 0, 1 -> w-dependent

        # --- w-dependent slab: transcendentals on (W, C) only --------------
        w_pos = lax.broadcasted_iota(jnp.int32, (w, 1), 0).astype(jnp.float32)
        ang_w = w_pos * omega                                # (W, C)
        pe_w = jnp.where(use_sin, jnp.sin(ang_w), jnp.cos(ang_w))

        # --- h-dependent slab: transcendentals on (tR, C) only -------------
        row0 = pl.program_id(0) * tr
        rows = row0 + lax.broadcasted_iota(jnp.int32, (tr, 1), 0)   # global row
        rows_f = rows.astype(jnp.float32)
        # Exact h = rows % H for rows < 2**22: float floor-div trick (the +0.5
        # keeps the quotient at least 0.5/H away from any integer).
        q = jnp.floor((rows_f + 0.5) * inv_h)
        h_pos = rows_f - q * float(h_size)                   # (tR, 1), exact
        ang_h = h_pos * omega                                # (tR, C)
        pe_h = jnp.where(use_sin, jnp.sin(ang_h), jnp.cos(ang_h))

        # --- assemble (tR, W, C): pure broadcast + select (VPU, HBM-bound) -
        pe = jnp.where(
            is_x_chan[None, :, :],                                   # (1, 1, C)
            jnp.broadcast_to(pe_w[None, :, :], (tr, w, c)),          # (tR, W, C)
            jnp.broadcast_to(pe_h[:, None, :], (tr, w, c)),          # (tR, W, C)
        )

        # Module semantics: pe computed in f32, cast to pe_dtype, then added.
        if jnp.dtype(pe_dtype) != jnp.dtype(jnp.float32):
            pe = pe.astype(pe_dtype)

        o_ref[...] = (x_ref[...].astype(out_dtype)
                      + pe.astype(out_dtype)).astype(o_ref.dtype)

    return kernel


def _choose_row_tile(nr, w, c, x_itemsize, out_itemsize,
                     budget_bytes=10 * 1024 * 1024):
    """Rows per block so 2x in + 2x out buffers + ~3 f32 temps fit the budget."""
    per_row = w * c * (2 * x_itemsize + 2 * out_itemsize + 12)
    tr = max(1, budget_bytes // max(1, per_row))
    return int(min(tr, nr))


def add_fixed_sincos_position_embedding(x, temperature: float = 10000.0,
                                        pe_dtype=jnp.float32, *,
                                        block_rows=None):
    """Adds fixed sin/cos position embeddings to x of shape [N, H, W, C]."""
    assert x.ndim == 4, f"Unsupported input shape: {x.shape}"
    n, h, w, c = x.shape
    num_parts = 4
    assert c % num_parts == 0, "channels must be a multiple of 4"
    dim_t = c // num_parts

    out_dtype = jnp.promote_types(x.dtype, jnp.dtype(pe_dtype))
    nr = n * h
    # float floor-div row->h recovery is exact in this range (always true for
    # realistic ViT feature maps).
    assert nr < (1 << 22), "N*H too large for the in-kernel row->h recovery"

    xf = x.reshape(nr, w, c)                       # free contiguous reshape

    if block_rows is None:
        block_rows = _choose_row_tile(
            nr, w, c, jnp.dtype(x.dtype).itemsize, jnp.dtype(out_dtype).itemsize)
    tr = int(min(block_rows, nr))
    grid = (pl.cdiv(nr, tr),)                      # last block masked if partial

    kernel = _make_kernel(temperature, dim_t, h, pe_dtype, out_dtype)

    out = pl.pallas_call(
        kernel,
        out_shape=jax.ShapeDtypeStruct((nr, w, c), out_dtype),
        grid_spec=pltpu.PrefetchScalarGridSpec(
            num_scalar_prefetch=0,
            grid=grid,
            in_specs=[pl.BlockSpec((tr, w, c), lambda i: (i, 0, 0))],
            out_specs=pl.BlockSpec((tr, w, c), lambda i: (i, 0, 0)),
        ),
        compiler_params=pltpu.CompilerParams(
            dimension_semantics=("parallel",),
            vmem_limit_bytes=32 * 1024 * 1024),
    )(xf)
    return out.reshape(n, h, w, c)


def _reference(x, temperature=10000.0, pe_dtype=jnp.float32):
    """Pure-JAX reference matching the PyTorch implementation."""
    _, h, w, c = x.shape
    dim_t = c // 4
    omega = jnp.arange(dim_t, dtype=jnp.float32) / dim_t
    omega = 1.0 / temperature ** omega
    y, xg = jnp.meshgrid(jnp.arange(h), jnp.arange(w), indexing="ij")
    y_enc = jnp.einsum("m,d->md", y.reshape(-1).astype(jnp.float32), omega)
    x_enc = jnp.einsum("m,d->md", xg.reshape(-1).astype(jnp.float32), omega)
    pe = jnp.concatenate(
        [jnp.sin(x_enc), jnp.cos(x_enc), jnp.sin(y_enc), jnp.cos(y_enc)], axis=1)
    pe = pe.reshape(1, h, w, c).astype(pe_dtype)
    return x + pe


if __name__ == "__main__":
    key = jax.random.PRNGKey(0)

    # 1) Small [N, H, W, C] with C % 4 == 0 (single block).
    x1 = jax.random.normal(key, (2, 8, 8, 32), dtype=jnp.float32)
    out1 = jax.block_until_ready(add_fixed_sincos_position_embedding(x1))
    ref1 = _reference(x1)
    assert out1.shape == x1.shape and out1.dtype == x1.dtype
    assert jnp.allclose(out1, ref1, atol=1e-5, rtol=1e-5)

    # 2) Larger C, more rows (still one block under the default budget).
    x2 = jax.random.normal(jax.random.PRNGKey(1), (2, 16, 8, 64), dtype=jnp.float32)
    out2 = jax.block_until_ready(add_fixed_sincos_position_embedding(x2))
    ref2 = _reference(x2)
    assert jnp.allclose(out2, ref2, atol=1e-5, rtol=1e-5)

    # 3) ViT-Tiny-like shape: non-power-of-two dim_t (48) and W = 14.  Force
    #    small row tiles to exercise the multi-block path, batch-crossing
    #    tiles, and a masked partial final block (28 rows, tiles of 7 and 8).
    x3 = jax.random.normal(jax.random.PRNGKey(2), (2, 14, 14, 192), dtype=jnp.float32)
    ref3 = _reference(x3)
    for rows in (7, 8):
        out3 = jax.block_until_ready(
            add_fixed_sincos_position_embedding(x3, block_rows=rows))
        assert jnp.allclose(out3, ref3, atol=1e-5, rtol=1e-5)

    print("KERNEL_OK")
</pallas_src>

<mosaic_0001>
module attributes {stable_mosaic.version = 11 : i64} {
  func.func @kernel(%arg0: i32, %arg1: memref<16x8x32xf32, #tpu.memory_space<vmem>>, %arg2: memref<16x8x32xf32, #tpu.memory_space<vmem>>) attributes {dimension_semantics = [#tpu.dimension_semantics<parallel>], iteration_bounds = array<i64: 1>, scalar_prefetch = 0 : i64, scratch_operands = 0 : i64, tpu.core_type = #tpu.core_type<tc>, window_params = [{transform_indices = @transform_0, window_bounds = array<i64: 16, 8, 32>}, {transform_indices = @transform_1, window_bounds = array<i64: 16, 8, 32>}]} {
    %0 = tpu.iota {dimensions = array<i32: 1>} : vector<1x32xi32>
    %c8_i32 = arith.constant 8 : i32
    %1 = vector.broadcast %c8_i32 : i32 to vector<1x32xi32>
    %2 = arith.cmpi sge, %0, %1 : vector<1x32xi32>
    %3 = arith.extui %2 : vector<1x32xi1> to vector<1x32xi32>
    %c16_i32 = arith.constant 16 : i32
    %4 = vector.broadcast %c16_i32 : i32 to vector<1x32xi32>
    %5 = arith.cmpi sge, %0, %4 : vector<1x32xi32>
    %6 = arith.extui %5 : vector<1x32xi1> to vector<1x32xi32>
    %c24_i32 = arith.constant 24 : i32
    %7 = vector.broadcast %c24_i32 : i32 to vector<1x32xi32>
    %8 = arith.cmpi sge, %0, %7 : vector<1x32xi32>
    %9 = arith.extui %8 : vector<1x32xi1> to vector<1x32xi32>
    %10 = arith.addi %3, %6 : vector<1x32xi32>
    %11 = arith.addi %10, %9 : vector<1x32xi32>
    %c8_i32_0 = arith.constant 8 : i32
    %12 = vector.broadcast %c8_i32_0 : i32 to vector<1x32xi32>
    %13 = arith.muli %11, %12 : vector<1x32xi32>
    %14 = arith.subi %0, %13 : vector<1x32xi32>
    %15 = arith.sitofp %14 : vector<1x32xi32> to vector<1x32xf32>
    %cst = arith.constant -1.15129256 : f32
    %16 = vector.broadcast %cst : f32 to vector<1x32xf32>
    %17 = arith.mulf %15, %16 : vector<1x32xf32>
    %18 = math.exp %17 : vector<1x32xf32>
    %c0_i32 = arith.constant 0 : i32
    %19 = vector.broadcast %c0_i32 : i32 to vector<1x32xi32>
    %20 = arith.cmpi eq, %11, %19 : vector<1x32xi32>
    %c2_i32 = arith.constant 2 : i32
    %21 = vector.broadcast %c2_i32 : i32 to vector<1x32xi32>
    %22 = arith.cmpi eq, %11, %21 : vector<1x32xi32>
    %23 = arith.ori %20, %22 : vector<1x32xi1>
    %c2_i32_1 = arith.constant 2 : i32
    %24 = vector.broadcast %c2_i32_1 : i32 to vector<1x32xi32>
    %25 = arith.cmpi slt, %11, %24 : vector<1x32xi32>
    %26 = tpu.iota {dimensions = array<i32: 0>} : vector<8x1xi32>
    %27 = arith.sitofp %26 : vector<8x1xi32> to vector<8x1xf32>
    %28 = vector.broadcast %27 : vector<8x1xf32> to vector<8x32xf32>
    %29 = vector.broadcast %18 : vector<1x32xf32> to vector<8x32xf32>
    %30 = arith.mulf %28, %29 : vector<8x32xf32>
    %31 = math.sin %30 : vector<8x32xf32>
    %32 = math.cos %30 : vector<8x32xf32>
    %33 = vector.shape_cast %23 : vector<1x32xi1> to vector<1x32xi1>
    %34 = vector.broadcast %33 : vector<1x32xi1> to vector<8x32xi1>
    %35 = arith.select %34, %31, %32 : vector<8x32xi1>, vector<8x32xf32>
    %c16_i32_2 = arith.constant 16 : i32
    %36 = arith.muli %arg0, %c16_i32_2 : i32
    %37 = tpu.iota {dimensions = array<i32: 0>} : vector<16x1xi32>
    %38 = vector.broadcast %36 : i32 to vector<16x1xi32>
    %39 = arith.addi %38, %37 : vector<16x1xi32>
    %40 = arith.sitofp %39 : vector<16x1xi32> to vector<16x1xf32>
    %cst_3 = arith.constant 5.000000e-01 : f32
    %41 = vector.broadcast %cst_3 : f32 to vector<16x1xf32>
    %42 = arith.addf %40, %41 : vector<16x1xf32>
    %cst_4 = arith.constant 1.250000e-01 : f32
    %43 = vector.broadcast %cst_4 : f32 to vector<16x1xf32>
    %44 = arith.mulf %42, %43 : vector<16x1xf32>
    %45 = math.floor %44 : vector<16x1xf32>
    %cst_5 = arith.constant 8.000000e+00 : f32
    %46 = vector.broadcast %cst_5 : f32 to vector<16x1xf32>
    %47 = arith.mulf %45, %46 : vector<16x1xf32>
    %48 = arith.subf %40, %47 : vector<16x1xf32>
    %49 = vector.broadcast %48 : vector<16x1xf32> to vector<16x32xf32>
    %50 = vector.broadcast %18 : vector<1x32xf32> to vector<16x32xf32>
    %51 = arith.mulf %49, %50 : vector<16x32xf32>
    %52 = math.sin %51 : vector<16x32xf32>
    %53 = math.cos %51 : vector<16x32xf32>
    %54 = vector.shape_cast %23 : vector<1x32xi1> to vector<1x32xi1>
    %55 = vector.broadcast %54 : vector<1x32xi1> to vector<16x32xi1>
    %56 = arith.select %55, %52, %53 : vector<16x32xi1>, vector<16x32xf32>
    %57 = vector.shape_cast %25 : vector<1x32xi1> to vector<1x1x32xi1>
    %58 = vector.shape_cast %35 : vector<8x32xf32> to vector<1x8x32xf32>
    %59 = vector.shape_cast %58 : vector<1x8x32xf32> to vector<1x8x32xf32>
    %60 = vector.broadcast %59 : vector<1x8x32xf32> to vector<16x8x32xf32>
    %61 = vector.shape_cast %56 : vector<16x32xf32> to vector<16x1x32xf32>
    %62 = vector.shape_cast %61 : vector<16x1x32xf32> to vector<16x1x32xf32>
    %63 = vector.broadcast %62 : vector<16x1x32xf32> to vector<16x8x32xf32>
    %64 = vector.shape_cast %57 : vector<1x1x32xi1> to vector<1x1x32xi1>
    %65 = vector.broadcast %64 : vector<1x1x32xi1> to vector<16x8x32xi1>
    %66 = arith.select %65, %60, %63 : vector<16x8x32xi1>, vector<16x8x32xf32>
    %c0 = arith.constant 0 : index
    %c0_6 = arith.constant 0 : index
    %c0_7 = arith.constant 0 : index
    %67 = vector.load %arg1[%c0, %c0_6, %c0_7] : memref<16x8x32xf32, #tpu.memory_space<vmem>>, vector<16x8x32xf32>
    %68 = arith.addf %67, %66 : vector<16x8x32xf32>
    %c0_8 = arith.constant 0 : index
    %c0_9 = arith.constant 0 : index
    %c0_10 = arith.constant 0 : index
    %69 = vector.load %arg2[%c0_8, %c0_9, %c0_10] : memref<16x8x32xf32, #tpu.memory_space<vmem>>, vector<16x8x32xf32>
    tpu.vector_store %arg2[%c0_8, %c0_9, %c0_10], %68 {strides = array<i32>} : memref<16x8x32xf32, #tpu.memory_space<vmem>>, vector<16x8x32xf32>,
    return
  }
  func.func @transform_0(%arg0: i32) -> (i32, i32, i32) {
    %c0_i32 = arith.constant 0 : i32
    %c0_i32_0 = arith.constant 0 : i32
    %c0_i32_1 = arith.constant 0 : i32
    return %arg0, %c0_i32, %c0_i32_0 : i32, i32, i32
  }
  func.func @transform_1(%arg0: i32) -> (i32, i32, i32) {
    %c0_i32 = arith.constant 0 : i32
    %c0_i32_0 = arith.constant 0 : i32
    %c0_i32_1 = arith.constant 0 : i32
    return %arg0, %c0_i32, %c0_i32_0 : i32, i32, i32
  }
}

</mosaic_0001>

<bundles_post_ra>
// kernel: tpu_custom_call.1
= control target key start
LH: loop header
LB: loop body
LE: loop exit
PB: predicated region body
PF: predicated region fallthrough
CT: control target
= control target key end

     0   :  { %6 = vsyncpa [#allocation3], 0  ;;  %s1654_s0 = inlined_call_operand.hbm [shape: f32[16,8,32], index: 0, kind: input, shape index: {}]   ;;  %s1655_s1 = inlined_call_operand.hbm [shape: f32[16,8,32], index: 1, kind: output, shape index: {}]  }
   0x1   :  { %7 = vsyncpa [#allocation4], 0  ;;  %s12_s8 = sshll.u32 %s1654_s0, 4  ;;  %s1217_s9 = smov [#allocation2]   ;;  %s13_s8 = int_to_ptr.hbm [resolvable:$true] %s12_s8 }
   0x2   :  { %s14_s10 = sshll.u32 %s1217_s9, 4  ;;  %s1218_s11 = smov 128   ;;  %s15_s10 = int_to_ptr.vmem [resolvable:$true] %s14_s10 }
   0x3   :  { %s1219_s12 = smov 8  }
   0x4   :  { %20 = dma.hbm_to_vmem [thread:$0]  %s13_s8, 2048, %s15_s10, [#allocation3], %s1218_s11, %s1218_s11, %s1219_s12  }
   0x5   :  { %1213 = dma.done.wait [#allocation3], 2048  }
   0x6   :  { %1214 = vsyncadd [#allocation3], 4294965248  ;;  %v25_v0 = vlaneseq  ;;  %v1220_v4 = vmov 0   ;;  %v1221_v55 = vmov 683565275   ;;  %s1227_s0 = smov [#allocation5]  }
   0x7   :  { %v1222_v57 = vmov 2475754826   ;;  %v1223_v59 = vmov 2131351028   ;;  %v1224_v61 = vmov 2102212464  }
   0x8   :  { %v26_v1 = vand.u32 127, %v25_v0  ;;  %v46_v2 = vshrl.u32 %v25_v0, 7  ;;  %v1225_v63 = vmov 920167782   ;;  %s1119_s13 = sshll.u32 %s1227_s0, 4  ;;  %s1121_s16 = sshll.u32 %s1655_s1, 4  ;;  %s1120_s13 = int_to_ptr.vmem [resolvable:$true] %s1119_s13  ;;  %s1122_s16 = int_to_ptr.hbm [resolvable:$true] %s1121_s16 }
   0xa   :  { %vm27_vm0 = vcmp.ge.s32.totalorder %v26_v1, 8  ;;  %vm29_vm1 = vcmp.ge.s32.totalorder %v26_v1, 16  ;;  %vm31_vm2 = vcmp.ge.s32.totalorder %v26_v1, 24  ;;  %v47_v3 = vcvt.s32.f32 %v46_v2 }
   0xb   :  { %v28_v5 = vsel %vm27_vm0, 1, %v1220_v4  ;;  %v30_v6 = vsel %vm29_vm1, 1, %v1220_v4  ;;  %v32_v7 = vsel %vm31_vm2, 1, %v1220_v4  ;;  %v362_v11 = vadd.s32 8, %v46_v2 }
   0xc   :  { %v33_v8 = vadd.s32 %v30_v6, %v28_v5  ;;  %v368_v9 = vadd.f32 0.5, %v47_v3 }
   0xd   :  { %v367_v15 = vcvt.s32.f32 %v362_v11 }
   0xe   :  { %v1247_v10 = vadd.s32 %v33_v8, %v32_v7  ;;  %v370_v13 = vmul.f32 0.125, %v368_v9  ;;  %v1226_v9 = vmov 1326507024  }
   0xf   :  { %v369_v17 = vadd.f32 0.5, %v367_v15 }
  0x10   :  { %v35_v12 = vmul.u32 8, %v1247_v10  ;;  %v372_v18 = vfloor.f32 %v370_v13 }
  0x11   :  { %v371_v20 = vmul.f32 0.125, %v369_v17 }
  0x12   :  { %v36_v14 = vsub.s32 %v26_v1, %v35_v12  ;;  %v374_v23 = vmul.f32 8.0, %v372_v18 }
  0x13   :  { %v373_v22 = vfloor.f32 %v371_v20 }
  0x14   :  { %v37_v16 = vcvt.s32.f32 %v36_v14  ;;  %v376_v25 = vsub.f32 %v47_v3, %v374_v23 }
  0x15   :  { %v375_v24 = vmul.f32 8.0, %v373_v22 }
  0x16   :  { %v38_v19 = vmul.f32 -1.1512926, %v37_v16 }
  0x17   :  { %v377_v26 = vsub.f32 %v367_v15, %v375_v24 }
  0x18   :  { %v39_v21 = vmul.f32 1.442695, %v38_v19 }
  0x1a   :  { %1163 = vpow2.f32 %v39_v21 }
  0x20   :  { %v1164_v27 = vpop.eup %1163 }
  0x21   :  { %v1250_v28 = vmul.f32 %v1164_v27, %v47_v3  ;;  %v1252_v29 = vmul.f32 %v1164_v27, %v376_v25  ;;  %v1254_v30 = vmul.f32 %v1164_v27, %v377_v26 }
  0x23   :  { %v49_v31 = vand.u32 2147483647, %v1250_v28  ;;  %v52_v32 = vand.u32 2139095040, %v1250_v28  ;;  %v380_v33 = vand.u32 2147483647, %v1252_v29  ;;  %v383_v34 = vand.u32 2139095040, %v1252_v29 }
  0x24   :  { %v538_v38 = vand.u32 2139095040, %v1254_v30 }
  0x25   :  { %v53_v35 = vshrl.u32 %v52_v32, 23  ;;  %v56_v36 = vand.u32 8388607, %v49_v31  ;;  %v384_v37 = vshrl.u32 %v383_v34, 23  ;;  %v387_v42 = vand.u32 8388607, %v380_v33 }
  0x26   :  { %v539_v45 = vshrl.u32 %v538_v38, 23 }
  0x27   :  { %v1134_v39 = vadd.s32 4294967169, %v53_v35  ;;  %v57_v40 = vor.u32 8388608, %v56_v36  ;;  %v1140_v41 = vadd.s32 4294967169, %v384_v37  ;;  %v388_v48 = vor.u32 8388608, %v387_v42 }
  0x28   :  { %v1271_v53 = vadd.s32 4294967169, %v539_v45 }
  0x29   :  { %v59_v43 = vadd.s32 1, %v1134_v39  ;;  %v390_v44 = vadd.s32 1, %v1140_v41  ;;  %v1265_v47 = vshll.u32 %v57_v40, 8  ;;  %v1279_v2 = vshll.u32 %v388_v48, 8 }
  0x2b   :  { %vm60_vm3 = vcmp.gt.s32.totalorder %v59_v43, 0  ;;  %vm391_vm4 = vcmp.gt.s32.totalorder %v390_v44, 0  ;;  %v98_v1 = vand.u32 65535, %v1265_v47  ;;  %v99_v7 = vshrl.u32 %v1265_v47, 16 }
  0x2c   :  { %v61_v46 = vsel %vm60_vm3, %v59_v43, 0  ;;  %v392_v50 = vsel %vm391_vm4, %v390_v44, 0 }
  0x2d   :  { %v63_v49 = vand.u32 31, %v61_v46  ;;  %v1267_v51 = vshrl.u32 %v61_v46, 5  ;;  %v1269_v52 = vand.u32 31, %v392_v50  ;;  %v1299_v21 = vshrl.u32 %v392_v50, 5 }
  0x2f   :  { %v64_v54 = vsub.s32 32, %v63_v49  ;;  %v66_v56 = vshll.u32 %v1221_v55, %v63_v49  ;;  %v69_v58 = vshll.u32 %v1222_v57, %v63_v49  ;;  %v72_v60 = vshll.u32 %v1223_v59, %v63_v49 }
  0x30   :  { %v75_v62 = vshll.u32 %v1224_v61, %v63_v49  ;;  %v78_v0 = vshll.u32 %v1225_v63, %v63_v49  ;;  %vm81_vm5 = vcmp.lt.s32.totalorder %v1267_v51, 1  ;;  %vm84_vm6 = vcmp.lt.s32.totalorder %v1267_v51, 4 }
  0x31   :  { %v67_v3 = vshrl.u32 %v1222_v57, %v64_v54  ;;  %v70_v5 = vshrl.u32 %v1223_v59, %v64_v54  ;;  %v73_v6 = vshrl.u32 %v1224_v61, %v64_v54  ;;  %v76_v8 = vshrl.u32 %v1225_v63, %v64_v54 }
  0x32   :  { %v79_v11 = vshrl.u32 %v1226_v9, %v64_v54  ;;  %v1290_v15 = vsub.s32 32, %v1269_v52  ;;  %v65_v16 = vshrl.u32 %v1221_v55, %v64_v54  ;;  %vm83_vm7 = vcmp.lt.s32.totalorder %v1267_v51, 3 }
  0x33   :  { %v68_v12 = vor.u32 %v67_v3, %v66_v56  ;;  %v71_v13 = vor.u32 %v70_v5, %v69_v58  ;;  %v74_v14 = vor.u32 %v73_v6, %v72_v60  ;;  %v77_v17 = vor.u32 %v76_v8, %v75_v62 }
  0x34   :  { %v80_v18 = vor.u32 %v79_v11, %v78_v0  ;;  %vm82_vm8 = vcmp.lt.s32.totalorder %v1267_v51, 2  ;;  %v397_v24 = vshll.u32 %v1221_v55, %v1269_v52  ;;  %v400_v25 = vshll.u32 %v1222_v57, %v1269_v52 }
  0x35   :  { %v89_v19 = vsel %vm81_vm5, %v68_v12, %v71_v13  ;;  %v93_v20 = vsel %vm81_vm5, %v71_v13, %v74_v14  ;;  %v90_v22 = vsel %vm84_vm6, %v77_v17, 920167782  ;;  %v86_v26 = vsel %vm84_vm6, %v74_v14, 2102212464 }
  0x36   :  { %v94_v23 = vsel %vm84_vm6, %v80_v18, 1326507024  ;;  %v91_v27 = vsel %vm83_vm7, %v74_v14, %v90_v22  ;;  %v398_v34 = vshrl.u32 %v1222_v57, %v1290_v15  ;;  %v85_v35 = vsel %vm81_vm5, %v65_v16, %v68_v12 }
  0x37   :  { %v95_v32 = vsel %vm83_vm7, %v77_v17, %v94_v23  ;;  %v92_v36 = vsel %vm82_vm8, %v89_v19, %v91_v27  ;;  %v401_v38 = vshrl.u32 %v1223_v59, %v1290_v15  ;;  %v87_v43 = vsel %vm83_vm7, %v71_v13, %v86_v26 }
  0x38   :  { %v96_v37 = vsel %vm82_vm8, %v93_v20, %v95_v32  ;;  %v122_v41 = vand.u32 65535, %v92_v36  ;;  %v123_v42 = vshrl.u32 %v92_v36, 16  ;;  %v1327_v44 = vor.u32 %v398_v34, %v397_v24 }
  0x39   :  { %v100_v39 = vand.u32 65535, %v96_v37  ;;  %v101_v40 = vshrl.u32 %v96_v37, 16  ;;  %v1329_v45 = vor.u32 %v401_v38, %v400_v25  ;;  %v403_v46 = vshll.u32 %v1223_v59, %v1269_v52 }
  0x3a   :  { %v404_v54 = vshrl.u32 %v1224_v61, %v1290_v15  ;;  %v124_v58 = vmul.u32 %v122_v41, %v98_v1  ;;  %v125_v60 = vmul.u32 %v123_v42, %v98_v1  ;;  %v126_v62 = vmul.u32 %v122_v41, %v99_v7 }
  0x3b   :  { %v102_v48 = vmul.u32 %v100_v39, %v98_v1  ;;  %v103_v49 = vmul.u32 %v101_v40, %v98_v1  ;;  %v104_v50 = vmul.u32 %v100_v39, %v99_v7  ;;  %v105_v56 = vmul.u32 %v101_v40, %v99_v7 }
  0x3c   :  { %v127_v6 = vmul.u32 %v123_v42, %v99_v7  ;;  %v128_v11 = vshll.u32 %v125_v60, 16  ;;  %v129_v12 = vshrl.u32 %v125_v60, 16  ;;  %v130_v13 = vshll.u32 %v126_v62, 16 }
  0x3d   :  { %v106_v0 = vshll.u32 %v103_v49, 16  ;;  %v107_v3 = vshrl.u32 %v103_v49, 16  ;;  %v108_v5 = vshll.u32 %v104_v50, 16  ;;  %v109_v8 = vshrl.u32 %v104_v50, 16 }
  0x3e   :  { %v131_v16 = vshrl.u32 %v126_v62, 16  ;;  %v406_v17 = vshll.u32 %v1224_v61, %v1269_v52  ;;  %vm132_vm10 = vc.u32 %v124_v58, %v128_v11  ;;  %v134_v19 = vadd.s32 %v128_v11, %v124_v58 }
  0x3f   :  { %vm110_vm9 = vc.u32 %v102_v48, %v106_v0  ;;  %v112_v14 = vadd.s32 %v106_v0, %v102_v48  ;;  %v407_v1 = vshrl.u32 %v1225_v63, %v1290_v15  ;;  %v133_v7 = vsel %vm132_vm10, 1, %v1220_v4 }
  0x40   :  { %v111_v18 = vsel %vm110_vm9, 1, %v1220_v4  ;;  %v409_v22 = vshll.u32 %v1225_v63, %v1269_v52  ;;  %v135_v24 = vadd.s32 %v133_v7, %v127_v6  ;;  %vm136_vm12 = vc.u32 %v134_v19, %v130_v13 }
  0x41   :  { %v113_v20 = vadd.s32 %v111_v18, %v105_v56  ;;  %vm114_vm11 = vc.u32 %v112_v14, %v108_v5  ;;  %v405_v25 = vor.u32 %v404_v54, %v403_v46  ;;  %v137_v27 = vsel %vm136_vm12, 1, %v1220_v4 }
  0x42   :  { %v115_v23 = vsel %vm114_vm11, 1, %v1220_v4  ;;  %v408_v32 = vor.u32 %v407_v1, %v406_v17  ;;  %v410_v34 = vshrl.u32 %v1226_v9, %v1290_v15  ;;  %v1347_v36 = vadd.s32 %v134_v19, %v130_v13 }
  0x43   :  { %v117_v26 = vadd.s32 %v115_v23, %v113_v20  ;;  %v139_v37 = vadd.s32 %v137_v27, %v135_v24  ;;  %vm412_vm13 = vcmp.lt.s32.totalorder %v1299_v21, 1  ;;  %vm414_vm14 = vcmp.lt.s32.totalorder %v1299_v21, 3 }
  0x44   :  { %v411_v38 = vor.u32 %v410_v34, %v409_v22  ;;  %vm413_vm15 = vcmp.lt.s32.totalorder %v1299_v21, 2  ;;  %vm415_vm0 = vcmp.lt.s32.totalorder %v1299_v21, 4  ;;  %v88_v39 = vsel %vm82_vm8, %v85_v35, %v87_v43 }
  0x45   :  { %v118_v52 = vadd.s32 %v117_v26, %v107_v3  ;;  %v140_v40 = vadd.s32 %v139_v37, %v129_v12  ;;  %v420_v41 = vsel %vm412_vm13, %v1327_v44, %v1329_v45  ;;  %v421_v42 = vsel %vm415_vm0, %v408_v32, 920167782 }
  0x46   :  { %v422_v48 = vsel %vm414_vm14, %v405_v25, %v421_v42  ;;  %v424_v49 = vsel %vm412_vm13, %v1329_v45, %v405_v25  ;;  %v429_v51 = vand.u32 65535, %v1279_v2  ;;  %v425_v50 = vsel %vm415_vm0, %v411_v38, 1326507024 }
  0x47   :  { %v1361_v46 = vadd.s32 %v118_v52, %v109_v8  ;;  %v141_v35 = vadd.s32 %v140_v40, %v131_v16  ;;  %v423_v43 = vsel %vm413_vm15, %v420_v41, %v422_v48  ;;  %v430_v54 = vshrl.u32 %v1279_v2, 16 }
  0x48   :  { %v142_v56 = vmul.u32 %v1265_v47, %v88_v39  ;;  %v426_v58 = vsel %vm414_vm14, %v408_v32, %v425_v50  ;;  %v453_v60 = vand.u32 65535, %v423_v43  ;;  %v454_v3 = vshrl.u32 %v423_v43, 16 }
  0x49   :  { %vm144_vm1 = vc.u32 %v1361_v46, %v1347_v36  ;;  %v145_v62 = vadd.s32 1, %v141_v35  ;;  %v427_v0 = vsel %vm413_vm15, %v424_v49, %v426_v58  ;;  %v545_v8 = vadd.s32 1, %v1271_v53 }
  0x4a   :  { %v431_v5 = vand.u32 65535, %v427_v0  ;;  %v432_v6 = vshrl.u32 %v427_v0, 16  ;;  %v455_v12 = vmul.u32 %v453_v60, %v429_v51  ;;  %v456_v13 = vmul.u32 %v454_v3, %v429_v51 }
  0x4b   :  { %v146_v11 = vsel %vm144_vm1, %v145_v62, %v141_v35  ;;  %v457_v47 = vmul.u32 %v453_v60, %v430_v54  ;;  %v396_v19 = vshrl.u32 %v1221_v55, %v1290_v15  ;;  %v458_v1 = vmul.u32 %v454_v3, %v430_v54 }
  0x4c   :  { %v147_v14 = vadd.s32 %v146_v11, %v142_v56  ;;  %v433_v16 = vmul.u32 %v431_v5, %v429_v51  ;;  %v434_v17 = vmul.u32 %v432_v6, %v429_v51  ;;  %v435_v18 = vmul.u32 %v431_v5, %v430_v54 }
  0x4d   :  { %v459_v20 = vshll.u32 %v456_v13, 16  ;;  %v436_v22 = vmul.u32 %v432_v6, %v430_v54  ;;  %v417_v53 = vsel %vm415_vm0, %v405_v25, 2102212464  ;;  %v461_v26 = vshll.u32 %v457_v47, 16 }
  0x4e   :  { %v148_v7 = vadd.s32 536870912, %v147_v14  ;;  %v437_v23 = vshll.u32 %v434_v17, 16  ;;  %v439_v24 = vshll.u32 %v435_v18, 16  ;;  %vm546_vm3 = vcmp.gt.s32.totalorder %v545_v8, 0 }
  0x4f   :  { %vm463_vm2 = vc.u32 %v455_v12, %v459_v20  ;;  %v416_v15 = vsel %vm412_vm13, %v396_v19, %v1327_v44  ;;  %v465_v52 = vadd.s32 %v459_v20, %v455_v12  ;;  %v438_v25 = vshrl.u32 %v434_v17, 16 }
  0x50   :  { %v1386_v27 = vshrl.u32 %v148_v7, 30  ;;  %vm441_vm4 = vc.u32 %v433_v16, %v437_v23  ;;  %v443_v32 = vadd.s32 %v437_v23, %v433_v16  ;;  %v464_v34 = vsel %vm463_vm2, 1, %v1220_v4 }
  0x51   :  { %v442_v37 = vsel %vm441_vm4, 1, %v1220_v4  ;;  %v466_v38 = vadd.s32 %v464_v34, %v458_v1  ;;  %v418_v41 = vsel %vm414_vm14, %v1329_v45, %v417_v53  ;;  %v460_v48 = vshrl.u32 %v456_v13, 16 }
  0x52   :  { %v150_v39 = vshll.u32 %v1386_v27, 30  ;;  %v444_v40 = vadd.s32 %v442_v37, %v436_v22  ;;  %vm445_vm5 = vc.u32 %v443_v32, %v439_v24  ;;  %vm467_vm6 = vc.u32 %v465_v52, %v461_v26 }
  0x53   :  { %v446_v42 = vsel %vm445_vm5, 1, %v1220_v4  ;;  %v440_v51 = vshrl.u32 %v435_v18, 16  ;;  %v468_v35 = vsel %vm467_vm6, 1, %v1220_v4  ;;  %v462_v43 = vshrl.u32 %v457_v47, 16 }
  0x54   :  { %v151_v49 = vsub.s32 %v147_v14, %v150_v39  ;;  %v448_v44 = vadd.s32 %v446_v42, %v444_v40  ;;  %v470_v50 = vadd.s32 %v468_v35, %v466_v38  ;;  %v547_v54 = vsel %vm546_vm3, %v545_v8, 0 }
  0x55   :  { %v1400_v60 = vadd.s32 %v465_v52, %v461_v26  ;;  %v419_v45 = vsel %vm413_vm15, %v416_v15, %v418_v41  ;;  %v535_v5 = vand.u32 2147483647, %v1254_v30  ;;  %v549_v6 = vand.u32 31, %v547_v54 }
  0x56   :  { %vm152_vm7 = vcmp.lt.s32.totalorder %v151_v49, 0  ;;  %v153_v56 = vsub.s32 0, %v151_v49  ;;  %v449_v58 = vadd.s32 %v448_v44, %v438_v25  ;;  %v471_v62 = vadd.s32 %v470_v50, %v460_v48 }
  0x57   :  { %v473_v13 = vmul.u32 %v1279_v2, %v419_v45  ;;  %v542_v21 = vand.u32 8388607, %v535_v5  ;;  %v1412_v14 = vsub.s32 32, %v549_v6  ;;  %v143_v16 = vadd.s32 %v1347_v36, %v1361_v46 }
  0x58   :  { %v154_v0 = vsel %vm152_vm7, %v153_v56, %v151_v49  ;;  %v1404_v3 = vadd.s32 %v449_v58, %v440_v51  ;;  %v472_v12 = vadd.s32 %v471_v62, %v462_v43  ;;  %v1416_v18 = vshrl.u32 %v547_v54, 5 }
  0x59   :  { %v155_v11 = vclz %v154_v0  ;;  %v555_v2 = vshll.u32 %v1222_v57, %v549_v6  ;;  %v558_v20 = vshll.u32 %v1223_v59, %v549_v6  ;;  %v561_v24 = vshll.u32 %v1224_v61, %v549_v6 }
  0x5a   :  { %vm475_vm8 = vc.u32 %v1404_v3, %v1400_v60  ;;  %v476_v47 = vadd.s32 1, %v472_v12  ;;  %v556_v26 = vshrl.u32 %v1223_v59, %v1412_v14  ;;  %v559_v36 = vshrl.u32 %v1224_v61, %v1412_v14 }
  0x5b   :  { %v1135_v8 = vadd.s32 4294967294, %v155_v11  ;;  %v562_v46 = vshrl.u32 %v1225_v63, %v1412_v14  ;;  %v564_v15 = vshll.u32 %v1225_v63, %v549_v6  ;;  %v565_v37 = vshrl.u32 %v1226_v9, %v1412_v14 }
  0x5c   :  { %v477_v17 = vsel %vm475_vm8, %v476_v47, %v472_v12  ;;  %v543_v38 = vor.u32 8388608, %v542_v21  ;;  %v552_v59 = vshll.u32 %v1221_v55, %v549_v6  ;;  %v553_v61 = vshrl.u32 %v1222_v57, %v1412_v14 }
  0x5d   :  { %vm1136_vm9 = vcmp.lt.s32.totalorder %v1135_v8, 0  ;;  %v478_v1 = vadd.s32 %v477_v17, %v473_v13  ;;  %v1436_v41 = vor.u32 %v556_v26, %v555_v2  ;;  %v1438_v42 = vor.u32 %v559_v36, %v558_v20 }
  0x5e   :  { %v158_v19 = vsel %vm1136_vm9, 0, %v1135_v8  ;;  %v563_v63 = vor.u32 %v562_v46, %v561_v24  ;;  %v566_v9 = vor.u32 %v565_v37, %v564_v15  ;;  %vm567_vm10 = vcmp.lt.s32.totalorder %v1416_v18, 1 }
  0x5f   :  { %v159_v7 = vsub.s32 32, %v158_v19  ;;  %v160_v22 = vshll.u32 %v151_v49, %v158_v19  ;;  %v163_v23 = vsub.s32 4294967266, %v158_v19  ;;  %v479_v53 = vadd.s32 536870912, %v478_v1 }
  0x60   :  { %vm570_vm11 = vcmp.lt.s32.totalorder %v1416_v18, 4  ;;  %v1442_v44 = vshll.u32 %v543_v38, 8  ;;  %v1444_v43 = vor.u32 %v553_v61, %v552_v59  ;;  %vm569_vm12 = vcmp.lt.s32.totalorder %v1416_v18, 3 }
  0x61   :  { %v161_v32 = vshrl.u32 %v143_v16, %v159_v7  ;;  %v164_v34 = vadd.s32 127, %v163_v23  ;;  %v1430_v52 = vshrl.u32 %v479_v53, 30  ;;  %vm568_vm14 = vcmp.lt.s32.totalorder %v1416_v18, 2 }
  0x62   :  { %v579_v50 = vsel %vm567_vm10, %v1436_v41, %v1438_v42  ;;  %v576_v56 = vsel %vm570_vm11, %v563_v63, 920167782  ;;  %v580_v58 = vsel %vm570_vm11, %v566_v9, 1326507024  ;;  %vm51_vm15 = vcmp.lt.s32.totalorder %v1250_v28, 0 }
  0x63   :  { %v162_v39 = vor.u32 %v161_v32, %v160_v22  ;;  %v165_v25 = vshll.u32 %v164_v34, 23  ;;  %v481_v40 = vshll.u32 %v1430_v52, 30  ;;  %v581_v62 = vsel %vm569_vm12, %v563_v63, %v580_v58 }
  0x64   :  { %v584_v0 = vand.u32 65535, %v1442_v44  ;;  %vm1462_vm0 = vcmp.le.f32.partialorder %v49_v31, 0.7853982  ;;  %v582_v13 = vsel %vm568_vm14, %v579_v50, %v581_v62  ;;  %v173_v8 = vsub.s32 4, %v1386_v27 }
  0x65   :  { %v166_v48 = vor.u32 4788187, %v165_v25  ;;  %v169_v49 = vcvt.s32.f32 %v162_v39  ;;  %v482_v51 = vsub.s32 %v478_v1, %v481_v40  ;;  %v575_v47 = vsel %vm567_vm10, %v1444_v43, %v1436_v41 }
  0x66   :  { %v577_v21 = vsel %vm569_vm12, %v1438_v42, %v576_v56  ;;  %v587_v31 = vshrl.u32 %v582_v13, 16  ;;  %v585_v1 = vshrl.u32 %v1442_v44, 16  ;;  %v586_v2 = vand.u32 65535, %v582_v13 }
  0x67   :  { %v167_v35 = vand.u32 2147483647, %v166_v48  ;;  %vm483_vm13 = vcmp.lt.s32.totalorder %v482_v51, 0  ;;  %v484_v57 = vsub.s32 0, %v482_v51  ;;  %v474_v22 = vadd.s32 %v1400_v60, %v1404_v3 }
  0x68   :  { %v589_v20 = vmul.u32 %v587_v31, %v584_v0  ;;  %v578_v23 = vsel %vm568_vm14, %v575_v47, %v577_v21  ;;  %v174_v24 = vsel %vm51_vm15, %v173_v8, %v1386_v27  ;;  %v588_v37 = vmul.u32 %v586_v2, %v584_v0 }
  0x69   :  { %v170_v54 = vmul.f32 %v169_v49, %v167_v35  ;;  %v485_v45 = vsel %vm483_vm13, %v484_v57, %v482_v51  ;;  %v608_v26 = vand.u32 65535, %v578_v23  ;;  %v590_v38 = vmul.u32 %v586_v2, %v585_v1 }
  0x6a   :  { %v486_v12 = vclz %v485_v45  ;;  %v592_v39 = vshll.u32 %v589_v20, 16  ;;  %v591_v61 = vmul.u32 %v587_v31, %v585_v1  ;;  %v609_v40 = vshrl.u32 %v578_v23, 16 }
  0x6b   :  { %v171_v11 = vxor.u32 2147483648, %v170_v54  ;;  %v176_v63 = vsel %vm1462_vm0, 0, %v174_v24  ;;  %v610_v49 = vmul.u32 %v608_v26, %v584_v0  ;;  %v594_v35 = vshll.u32 %v590_v38, 16 }
  0x6c   :  { %v1141_v17 = vadd.s32 4294967294, %v486_v12  ;;  %vm596_vm2 = vc.u32 %v588_v37, %v592_v39  ;;  %v598_v45 = vadd.s32 %v592_v39, %v588_v37  ;;  %vm1498_vm3 = vcmp.le.f32.partialorder %v380_v33, 0.7853982 }
  0x6d   :  { %v172_v16 = vsel %vm51_vm15, %v171_v11, %v170_v54  ;;  %v597_v56 = vsel %vm596_vm2, 1, %v1220_v4  ;;  %v611_v11 = vmul.u32 %v609_v40, %v584_v0  ;;  %vm382_vm4 = vcmp.lt.s32.totalorder %v1252_v29, 0 }
  0x6e   :  { %v1481_v19 = vsel %vm1462_vm0, %v1250_v28, %v172_v16  ;;  %vm1142_vm1 = vcmp.lt.s32.totalorder %v1141_v17, 0  ;;  %v599_v62 = vadd.s32 %v597_v56, %v591_v61  ;;  %v551_v12 = vshrl.u32 %v1221_v55, %v1412_v14 }
  0x6f   :  { %v177_v7 = vmul.f32 %v1481_v19, %v1481_v19  ;;  %v489_v53 = vsel %vm1142_vm1, 0, %v1141_v17  ;;  %v593_v13 = vshrl.u32 %v589_v20, 16  ;;  %vm600_vm5 = vc.u32 %v598_v45, %v594_v35 }
  0x70   :  { %v490_v32 = vsub.s32 32, %v489_v53  ;;  %v491_v34 = vshll.u32 %v482_v51, %v489_v53  ;;  %v494_v15 = vsub.s32 4294967266, %v489_v53  ;;  %v612_v51 = vmul.u32 %v608_v26, %v585_v1 }
  0x71   :  { %v178_v36 = vmul.f32 -0.001358992, %v177_v7  ;;  %v185_v46 = vmul.f32 -0.00019511016, %v177_v7  ;;  %v613_v47 = vmul.u32 %v609_v40, %v585_v1  ;;  %v614_v21 = vshll.u32 %v611_v11, 16 }
  0x72   :  { %v492_v3 = vshrl.u32 %v474_v22, %v490_v32  ;;  %v495_v59 = vadd.s32 127, %v494_v15  ;;  %v193_v16 = vadd.s32 3, %v176_v63  ;;  %v601_v0 = vsel %vm600_vm5, 1, %v1220_v4 }
  0x73   :  { %v179_v25 = vadd.f32 0.041655596, %v178_v36  ;;  %v186_v60 = vadd.f32 0.008332121, %v185_v46  ;;  %v616_v17 = vshll.u32 %v612_v51, 16  ;;  %v603_v22 = vadd.s32 %v601_v0, %v599_v62 }
  0x74   :  { %v493_v48 = vor.u32 %v492_v3, %v491_v34  ;;  %v496_v9 = vshll.u32 %v495_v59, 23  ;;  %vm618_vm6 = vc.u32 %v610_v49, %v614_v21  ;;  %v504_v23 = vsub.s32 4, %v1430_v52 }
  0x75   :  { %v187_v27 = vmul.f32 %v186_v60, %v177_v7  ;;  %v180_v57 = vmul.f32 %v179_v25, %v177_v7  ;;  %v572_v55 = vsel %vm570_vm11, %v1438_v42, 2102212464  ;;  %v619_v14 = vsel %vm618_vm6, 1, %v1220_v4 }
  0x76   :  { %v500_v54 = vcvt.s32.f32 %v493_v48  ;;  %v497_v58 = vor.u32 4788187, %v496_v9  ;;  %v620_v20 = vadd.s32 %v614_v21, %v610_v49  ;;  %v595_v24 = vshrl.u32 %v590_v38, 16 }
  0x77   :  { %v188_v50 = vadd.f32 -0.16666654, %v187_v27  ;;  %v181_v31 = vadd.f32 -0.4999988, %v180_v57  ;;  %v604_v53 = vadd.s32 %v603_v22, %v593_v13  ;;  %v621_v26 = vadd.s32 %v619_v14, %v613_v47 }
  0x78   :  { %v498_v8 = vand.u32 2147483647, %v497_v58  ;;  %v571_v46 = vsel %vm567_vm10, %v551_v12, %v1444_v43  ;;  %v615_v32 = vshrl.u32 %v611_v11, 16  ;;  %vm622_vm7 = vc.u32 %v620_v20, %v616_v17 }
  0x79   :  { %v189_v2 = vmul.f32 %v188_v50, %v177_v7  ;;  %v182_v36 = vmul.f32 %v181_v31, %v177_v7  ;;  %v573_v42 = vsel %vm569_vm12, %v1436_v41, %v572_v55  ;;  %v623_v37 = vsel %vm622_vm7, 1, %v1220_v4 }
  0x7a   :  { %v501_v33 = vmul.f32 %v500_v54, %v498_v8  ;;  %v505_v7 = vsel %vm382_vm4, %v504_v23, %v1430_v52  ;;  %v617_v38 = vshrl.u32 %v612_v51, 16  ;;  %v625_v39 = vadd.s32 %v623_v37, %v621_v26 }
  0x7b   :  { %v190_v34 = vadd.f32 1.0, %v189_v2  ;;  %v1526_v60 = vadd.s32 %v604_v53, %v595_v24  ;;  %v1528_v3 = vadd.s32 %v620_v20, %v616_v17  ;;  %v183_v59 = vadd.f32 1.0, %v182_v36 }
  0x7c   :  { %v502_v1 = vxor.u32 2147483648, %v501_v33  ;;  %v194_v61 = vand.u32 3, %v193_v16  ;;  %v574_v4 = vsel %vm568_vm14, %v571_v46, %v573_v42  ;;  %v626_v41 = vadd.s32 %v625_v39, %v615_v32  ;;  %v1077_v46 = vld [vmem:[#allocation2 + $0x58] sm:$0xff] }
  0x7d   :  { %v191_v40 = vmul.f32 %v190_v34, %v1481_v19  ;;  %v507_v52 = vsel %vm1498_vm3, 0, %v505_v7  ;;  %v348_v49 = vand.u32 3, %v176_v63  ;;  %v628_v57 = vmul.u32 %v1442_v44, %v574_v4 }
  0x7e   :  { %v503_v15 = vsel %vm382_vm4, %v502_v1, %v501_v33  ;;  %v627_v9 = vadd.s32 %v626_v41, %v617_v38  ;;  %vm630_vm8 = vc.u32 %v1526_v60, %v1528_v3  ;;  %v200_v50 = vxor.u32 2147483648, %v183_v59 }
  0x7f   :  { %v506_v43 = vsel %vm1498_vm3, %v1252_v29, %v503_v15  ;;  %v524_v18 = vadd.s32 3, %v507_v52  ;;  %v197_v56 = vxor.u32 2147483648, %v191_v40  ;;  %vm199_vm9 = vcmp.eq.s32.totalorder %v194_v61, 2 }
  0x80   :  { %v508_v25 = vmul.f32 %v506_v43, %v506_v43  ;;  %v631_v54 = vadd.s32 1, %v627_v9  ;;  %vm196_vm10 = vcmp.eq.s32.totalorder %v194_v61, 0  ;;  %vm350_vm11 = vcmp.eq.s32.totalorder %v348_v49, 0 }
  0x81   :  { %vm353_vm12 = vcmp.eq.s32.totalorder %v348_v49, 2  ;;  %vm195_vm13 = vcmp.lt.s32.totalorder %v194_v61, 2  ;;  %v201_v6 = vsel %vm199_vm9, %v200_v50, %v191_v40  ;;  %v525_v44 = vand.u32 3, %v524_v18  ;;  %v1069_v18 = vld [vmem:[#allocation2 + $0x18] sm:$0xff] }
  0x82   :  { %v509_v27 = vmul.f32 -0.001358992, %v508_v25  ;;  %v516_v48 = vmul.f32 -0.00019511016, %v508_v25  ;;  %v632_v45 = vsel %vm630_vm8, %v631_v54, %v627_v9  ;;  %v834_v12 = vand.u32 3, %v507_v52 }
  0x83   :  { %v633_v11 = vadd.s32 %v632_v45, %v628_v57  ;;  %v198_v13 = vsel %vm196_vm10, %v183_v59, %v197_v56  ;;  %vm41_vm14 = vcmp.eq.s32.totalorder %v1247_v10, 0  ;;  %vm349_vm15 = vcmp.lt.s32.totalorder %v348_v49, 2  ;;  %v1068_v57 = vld [vmem:[#allocation2 + $0x10] sm:$0xff] }
  0x84   :  { %v510_v35 = vadd.f32 0.041655596, %v509_v27  ;;  %v517_v51 = vadd.f32 0.008332121, %v516_v48  ;;  %v352_v31 = vsel %vm350_vm11, %v183_v59, %v197_v56  ;;  %v355_v16 = vsel %vm353_vm12, %v200_v50, %v191_v40  ;;  %v1066_v59 = vld [vmem:[#allocation2] sm:$0xff] }
  0x85   :  { %v634_v21 = vadd.s32 536870912, %v633_v11  ;;  %vm42_vm0 = vcmp.eq.s32.totalorder %v1247_v10, 2  ;;  %vm192_vm1 = vweird.f32 %v1250_v28  ;;  %v202_v33 = vsel %vm195_vm13, %v198_v13, %v201_v6  ;;  %v1071_v6 = vld [vmem:[#allocation2 + $0x28] sm:$0xff] }
  0x86   :  { %v511_v19 = vmul.f32 %v510_v35, %v508_v25  ;;  %v518_v58 = vmul.f32 %v517_v51, %v508_v25  ;;  %vm530_vm2 = vcmp.eq.s32.totalorder %v525_v44, 2  ;;  %vm839_vm3 = vcmp.eq.s32.totalorder %v834_v12, 2  ;;  %vm1557_vm9 = vmor %vm41_vm14, %vm42_vm0  ;;  %v1067_v35 = vld [vmem:[#allocation2 + $0x8] sm:$0xff] }
  0x87   :  { %v1541_v2 = vshrl.u32 %v634_v21, 30  ;;  %v356_v22 = vsel %vm349_vm15, %v352_v31, %v355_v16  ;;  %vm526_vm4 = vcmp.lt.s32.totalorder %v525_v44, 2  ;;  %vm527_vm5 = vcmp.eq.s32.totalorder %v525_v44, 0  ;;  %v1072_v21 = vld [vmem:[#allocation2 + $0x30] sm:$0xff] }
  0x88   :  { %v512_v63 = vadd.f32 -0.4999988, %v511_v19  ;;  %v519_v62 = vadd.f32 -0.16666654, %v518_v58  ;;  %vm835_vm6 = vcmp.lt.s32.totalorder %v834_v12, 2  ;;  %vm836_vm7 = vcmp.eq.s32.totalorder %v834_v12, 0 }
  0x89   :  { %v636_v14 = vshll.u32 %v1541_v2, 30  ;;  %v203_v26 = vsel %vm192_vm1, nan, %v202_v33  ;;  %v357_v36 = vsel %vm192_vm1, nan, %v356_v22  ;;  %vm523_vm8 = vweird.f32 %v1252_v29  ;;  %v1070_v19 = vld [vmem:[#allocation2 + $0x20] sm:$0xff]  ;;  %v1073_v33 = vld [vmem:[#allocation2 + $0x38] sm:$0xff] }
  0x8a   :  { %v513_v8 = vmul.f32 %v512_v63, %v508_v25  ;;  %v520_v47 = vmul.f32 %v519_v62, %v508_v25  ;;  %vm44_vm11 = vcmp.lt.s32.totalorder %v1247_v10, 2  ;;  %vm1098_vm12 = vcmask 261120  }
  0x8b   :  { %v1546_v53 = vsub.s32 %v633_v11, %v636_v14  ;;  %vm537_vm14 = vcmp.lt.s32.totalorder %v1254_v30, 0  ;;  %vm536_vm15 = vcmp.le.f32.partialorder %v535_v5, 0.7853982 }
  0x8c   :  { %v514_v0 = vadd.f32 1.0, %v513_v8  ;;  %v521_v17 = vadd.f32 1.0, %v520_v47 }
  0x8d   :  { %vm638_vm10 = vcmp.lt.s32.totalorder %v1546_v53, 0  ;;  %v639_v15 = vsub.s32 0, %v1546_v53 }
  0x8e   :  { %v522_v23 = vmul.f32 %v521_v17, %v506_v43  ;;  %v531_v55 = vxor.u32 2147483648, %v514_v0  ;;  %v1568_v43 = vsel %vm1557_vm9, %v203_v26, %v357_v36 }
  0x8f   :  { %v640_v7 = vsel %vm638_vm10, %v639_v15, %v1546_v53 }
  0x90   :  { %v528_v20 = vxor.u32 2147483648, %v522_v23  ;;  %v532_v1 = vsel %vm530_vm2, %v531_v55, %v522_v23  ;;  %v841_v24 = vsel %vm839_vm3, %v531_v55, %v522_v23  ;;  %v641_v39 = vclz %v640_v7 }
  0x92   :  { %v529_v32 = vsel %vm527_vm5, %v514_v0, %v528_v20  ;;  %v838_v34 = vsel %vm836_vm7, %v514_v0, %v528_v20  ;;  %v1144_v23 = vadd.s32 4294967294, %v641_v39  ;;  %v629_v20 = vadd.s32 %v1528_v3, %v1526_v60 }
  0x93   :  { %v533_v42 = vsel %vm526_vm4, %v529_v32, %v532_v1  ;;  %v842_v28 = vsel %vm835_vm6, %v838_v34, %v841_v24  ;;  %vm678_vm6 = vweird.f32 %v1254_v30 }
  0x94   :  { %v534_v29 = vsel %vm523_vm8, nan, %v533_v42  ;;  %v843_v37 = vsel %vm523_vm8, nan, %v842_v28  ;;  %vm1145_vm13 = vcmp.lt.s32.totalorder %v1144_v23, 0 }
  0x95   :  { %v998_v38 = vsel %vm1557_vm9, %v534_v29, %v843_v37  ;;  %v644_v1 = vsel %vm1145_vm13, 0, %v1144_v23  ;;  %v659_v37 = vsub.s32 4, %v1541_v2  ;;  %v1075_v23 = vld [vmem:[#allocation2 + $0x48] sm:$0xff] }
  0x96   :  { %v1016_v25 = vperm.slane %v998_v38, 0  ;;  %v1002_v61 = vrot.slane %v998_v38, 1  ;;  %v1003_v4 = vrot.slane %v998_v38, 2  ;;  %v1004_v41 = vrot.slane %v998_v38, 3 }
  0x97   :  { %v1005_v40 = vrot.slane %v998_v38, 4  ;;  %v1006_v52 = vrot.slane %v998_v38, 5  ;;  %v1007_v27 = vrot.slane %v998_v38, 6  ;;  %v1008_v48 = vrot.slane %v998_v38, 7 }
  0x98   :  { %v1050_v49 = vsel %vm44_vm11, %v1568_v43, %v1016_v25  ;;  %v1017_v9 = vperm.slane %v1002_v61, 0  ;;  %v1018_v51 = vperm.slane %v1003_v4, 0  ;;  %v1019_v50 = vperm.slane %v1004_v41, 0 }
  0x99   :  { %v1082_v54 = vadd.f32 %v1066_v59, %v1050_v49  ;;  %v1020_v56 = vperm.slane %v1005_v40, 0  ;;  %v1021_v58 = vperm.slane %v1006_v52, 0  ;;  %v1022_v45 = vperm.slane %v1007_v27, 0 }
  0x9a   :  { %v1051_v63 = vsel %vm44_vm11, %v1568_v43, %v1017_v9  ;;  %v1052_v62 = vsel %vm44_vm11, %v1568_v43, %v1018_v51  ;;  %v1053_v11 = vsel %vm44_vm11, %v1568_v43, %v1019_v50  ;;  %v1023_v44 = vperm.slane %v1008_v48, 0 }
  0x9b   :  { %1099 = vst.msk [vmem:[#allocation5] sm:$0xff] %vm1098_vm12, %v1082_v54  ;;  %v1083_v12 = vadd.f32 %v1067_v35, %v1051_v63  ;;  %v1084_v13 = vadd.f32 %v1068_v57, %v1052_v62  ;;  %v1085_v8 = vadd.f32 %v1069_v18, %v1053_v11  ;;  %v1054_v47 = vsel %vm44_vm11, %v1568_v43, %v1020_v56 }
  0x9c   :  { %v1086_v31 = vadd.f32 %v1070_v19, %v1054_v47  ;;  %v1055_v16 = vsel %vm44_vm11, %v1568_v43, %v1021_v58  ;;  %v1056_v0 = vsel %vm44_vm11, %v1568_v43, %v1022_v45  ;;  %v1057_v17 = vsel %vm44_vm11, %v1568_v43, %v1023_v44 }
  0x9d   :  { %1100 = vst.msk [vmem:[#allocation5 + $0x8] sm:$0xff] %vm1098_vm12, %v1083_v12  ;;  %v1087_v22 = vadd.f32 %v1071_v6, %v1055_v16  ;;  %v1088_v55 = vadd.f32 %v1072_v21, %v1056_v0  ;;  %v1089_v14 = vadd.f32 %v1073_v33, %v1057_v17  ;;  %v645_v24 = vsub.s32 32, %v644_v1 }
  0x9e   :  { %1101 = vst.msk [vmem:[#allocation5 + $0x10] sm:$0xff] %vm1098_vm12, %v1084_v13  ;;  %v646_v26 = vshll.u32 %v1546_v53, %v644_v1  ;;  %v649_v36 = vsub.s32 4294967266, %v644_v1  ;;  %v660_v38 = vsel %vm537_vm14, %v659_v37, %v1541_v2 }
  0x9f   :  { %1102 = vst.msk [vmem:[#allocation5 + $0x18] sm:$0xff] %vm1098_vm12, %v1085_v8  ;;  %v647_v32 = vshrl.u32 %v629_v20, %v645_v24  ;;  %v662_v59 = vsel %vm536_vm15, 0, %v660_v38  ;;  %v1074_v8 = vld [vmem:[#allocation2 + $0x40] sm:$0xff] }
  0xa0   :  { %1103 = vst.msk [vmem:[#allocation5 + $0x20] sm:$0xff] %vm1098_vm12, %v1086_v31  ;;  %v650_v34 = vadd.s32 127, %v649_v36  ;;  %v679_v52 = vadd.s32 3, %v662_v59  ;;  %v988_v51 = vand.u32 3, %v662_v59 }
  0xa1   :  { %1104 = vst.msk [vmem:[#allocation5 + $0x28] sm:$0xff] %vm1098_vm12, %v1087_v22  ;;  %v648_v15 = vor.u32 %v647_v32, %v646_v26  ;;  %v1078_v26 = vld [vmem:[#allocation2 + $0x60] sm:$0xff] }
  0xa2   :  { %1105 = vst.msk [vmem:[#allocation5 + $0x30] sm:$0xff] %vm1098_vm12, %v1088_v55  ;;  %v651_v42 = vshll.u32 %v650_v34, 23  ;;  %v680_v35 = vand.u32 3, %v679_v52  ;;  %vm993_vm1 = vcmp.eq.s32.totalorder %v988_v51, 2  ;;  %vm990_vm4 = vcmp.eq.s32.totalorder %v988_v51, 0 }
  0xa3   :  { %1106 = vst.msk [vmem:[#allocation5 + $0x38] sm:$0xff] %vm1098_vm12, %v1089_v14  ;;  %v655_v60 = vcvt.s32.f32 %v648_v15  ;;  %vm989_vm5 = vcmp.lt.s32.totalorder %v988_v51, 2  ;;  %v1076_v14 = vld [vmem:[#allocation2 + $0x50] sm:$0xff] }
  0xa4   :  { %v652_v28 = vor.u32 4788187, %v651_v42  ;;  %vm685_vm0 = vcmp.eq.s32.totalorder %v680_v35, 2  ;;  %vm681_vm2 = vcmp.lt.s32.totalorder %v680_v35, 2  ;;  %vm682_vm3 = vcmp.eq.s32.totalorder %v680_v35, 0 }
  0xa6   :  { %v653_v3 = vand.u32 2147483647, %v652_v28  ;;  %v1079_v28 = vld [vmem:[#allocation2 + $0x68] sm:$0xff] }
  0xa8   :  { %v656_v29 = vmul.f32 %v655_v60, %v653_v3 }
  0xaa   :  { %v657_v53 = vxor.u32 2147483648, %v656_v29 }
  0xac   :  { %v658_v7 = vsel %vm537_vm14, %v657_v53, %v656_v29 }
  0xad   :  { %v661_v39 = vsel %vm536_vm15, %v1254_v30, %v658_v7  ;;  %v1080_v7 = vld [vmem:[#allocation2 + $0x70] sm:$0xff] }
  0xae   :  { %v663_v25 = vmul.f32 %v661_v39, %v661_v39 }
  0xb0   :  { %v664_v61 = vmul.f32 -0.001358992, %v663_v25  ;;  %v671_v4 = vmul.f32 -0.00019511016, %v663_v25 }
  0xb2   :  { %v665_v41 = vadd.f32 0.041655596, %v664_v61  ;;  %v672_v40 = vadd.f32 0.008332121, %v671_v4  ;;  %v1081_v61 = vld [vmem:[#allocation2 + $0x78] sm:$0xff] }
  0xb4   :  { %v666_v27 = vmul.f32 %v665_v41, %v663_v25  ;;  %v673_v48 = vmul.f32 %v672_v40, %v663_v25 }
  0xb6   :  { %v667_v49 = vadd.f32 -0.4999988, %v666_v27  ;;  %v674_v9 = vadd.f32 -0.16666654, %v673_v48 }
  0xb8   :  { %v668_v5 = vmul.f32 %v667_v49, %v663_v25  ;;  %v675_v57 = vmul.f32 %v674_v9, %v663_v25 }
  0xba   :  { %v669_v50 = vadd.f32 1.0, %v668_v5  ;;  %v676_v18 = vadd.f32 1.0, %v675_v57 }
  0xbc   :  { %v677_v2 = vmul.f32 %v676_v18, %v661_v39  ;;  %v686_v54 = vxor.u32 2147483648, %v669_v50 }
  0xbe   :  { %v683_v56 = vxor.u32 2147483648, %v677_v2  ;;  %v687_v19 = vsel %vm685_vm0, %v686_v54, %v677_v2  ;;  %v995_v58 = vsel %vm993_vm1, %v686_v54, %v677_v2 }
  0xc0   :  { %v684_v45 = vsel %vm682_vm3, %v669_v50, %v683_v56  ;;  %v992_v63 = vsel %vm990_vm4, %v669_v50, %v683_v56 }
  0xc1   :  { %v688_v62 = vsel %vm681_vm2, %v684_v45, %v687_v19  ;;  %v996_v11 = vsel %vm989_vm5, %v992_v63, %v995_v58 }
  0xc2   :  { %v689_v6 = vsel %vm678_vm6, nan, %v688_v62  ;;  %v997_v44 = vsel %vm678_vm6, nan, %v996_v11 }
  0xc3   :  { %v999_v12 = vsel %vm1557_vm9, %v689_v6, %v997_v44 }
  0xc4   :  { %v1024_v13 = vperm.slane %v999_v12, 0  ;;  %v1009_v47 = vrot.slane %v999_v12, 1  ;;  %v1010_v21 = vrot.slane %v999_v12, 2  ;;  %v1011_v31 = vrot.slane %v999_v12, 3 }
  0xc5   :  { %v1012_v16 = vrot.slane %v999_v12, 4  ;;  %v1013_v0 = vrot.slane %v999_v12, 5  ;;  %v1014_v17 = vrot.slane %v999_v12, 6  ;;  %v1015_v33 = vrot.slane %v999_v12, 7 }
  0xc6   :  { %v1058_v30 = vsel %vm44_vm11, %v1568_v43, %v1024_v13  ;;  %v1025_v22 = vperm.slane %v1009_v47, 0  ;;  %v1026_v55 = vperm.slane %v1010_v21, 0  ;;  %v1027_v20 = vperm.slane %v1011_v31, 0 }
  0xc7   :  { %v1090_v1 = vadd.f32 %v1074_v8, %v1058_v30  ;;  %v1028_v24 = vperm.slane %v1012_v16, 0  ;;  %v1029_v36 = vperm.slane %v1013_v0, 0  ;;  %v1030_v32 = vperm.slane %v1014_v17, 0 }
  0xc8   :  { %v1059_v34 = vsel %vm44_vm11, %v1568_v43, %v1025_v22  ;;  %v1060_v15 = vsel %vm44_vm11, %v1568_v43, %v1026_v55  ;;  %v1061_v42 = vsel %vm44_vm11, %v1568_v43, %v1027_v20  ;;  %v1031_v60 = vperm.slane %v1015_v33, 0 }
  0xc9   :  { %1107 = vst.msk [vmem:[#allocation5 + $0x40] sm:$0xff] %vm1098_vm12, %v1090_v1  ;;  %v1091_v3 = vadd.f32 %v1075_v23, %v1059_v34  ;;  %v1092_v29 = vadd.f32 %v1076_v14, %v1060_v15  ;;  %v1093_v37 = vadd.f32 %v1077_v46, %v1061_v42  ;;  %v1062_v53 = vsel %vm44_vm11, %v1568_v43, %v1028_v24 }
  0xca   :  { %v1094_v38 = vadd.f32 %v1078_v26, %v1062_v53  ;;  %v1063_v39 = vsel %vm44_vm11, %v1568_v43, %v1029_v36  ;;  %v1064_v25 = vsel %vm44_vm11, %v1568_v43, %v1030_v32  ;;  %v1065_v59 = vsel %vm44_vm11, %v1568_v43, %v1031_v60 }
  0xcb   :  { %1108 = vst.msk [vmem:[#allocation5 + $0x48] sm:$0xff] %vm1098_vm12, %v1091_v3  ;;  %v1095_v4 = vadd.f32 %v1079_v28, %v1063_v39  ;;  %v1096_v41 = vadd.f32 %v1080_v7, %v1064_v25  ;;  %v1097_v40 = vadd.f32 %v1081_v61, %v1065_v59 }
  0xcc   :  { %1109 = vst.msk [vmem:[#allocation5 + $0x50] sm:$0xff] %vm1098_vm12, %v1092_v29 }
  0xcd   :  { %1110 = vst.msk [vmem:[#allocation5 + $0x58] sm:$0xff] %vm1098_vm12, %v1093_v37 }
  0xce   :  { %1111 = vst.msk [vmem:[#allocation5 + $0x60] sm:$0xff] %vm1098_vm12, %v1094_v38 }
  0xcf   :  { %1112 = vst.msk [vmem:[#allocation5 + $0x68] sm:$0xff] %vm1098_vm12, %v1095_v4 }
  0xd0   :  { %1113 = vst.msk [vmem:[#allocation5 + $0x70] sm:$0xff] %vm1098_vm12, %v1096_v41 }
  0xd1   :  { %1114 = vst.msk [vmem:[#allocation5 + $0x78] sm:$0xff] %vm1098_vm12, %v1097_v40 }
  0xd2   :  { %1127 = dma.vmem_to_hbm [thread:$0]  %s1120_s13, 2048, %s1122_s16, [#allocation4], %s1218_s11, %s1218_s11, %s1219_s12  }
  0xd3   :  { %1215 = dma.done.wait [#allocation4], 2048  }
  0xd4   :  { %1216 = vsyncadd [#allocation4], 4294965248 }
  0xd5   :  { %1132 = vsyncpa [#allocation3], 1 }
  0xd6   :  { %1133 = vsyncpa [#allocation4], 1 }

</bundles_post_ra>
